<compile_context>
chip_gen: v5e
topology: v5e:2x2
jax: 0.10.0
libtpu: 0.0.40
codegen_flags: <defaults>
</compile_context>

<pallas_src>
import functools

import jax
import jax.numpy as jnp
from jax.experimental import pallas as pl
from jax.experimental.pallas import tpu as pltpu


# ---------------------------------------------------------------------------
# Kernels
# ---------------------------------------------------------------------------
def _bias_block(bias_ref, j, tn):
    """Bias rows for row-tile j.

    If the bias table is VMEM-resident (constant index map -> fetched from HBM
    exactly once for the whole grid) its ref holds all (padded) rows and we
    slice the tile here; otherwise Pallas already delivered a (tn, E) tile.
    """
    if bias_ref.shape[0] == tn:
        return bias_ref[...]
    start = pl.multiple_of(j * tn, 8)
    return bias_ref[pl.ds(start, tn), :]


def _pos_enc_add_kernel(x_ref, bias_ref, out_ref):
    """cls_token is None: broadcasted elementwise add, one aligned full-tile store."""
    j = pl.program_id(1)
    tn = x_ref.shape[1]
    out_ref[...] = (x_ref[...] + _bias_block(bias_ref, j, tn)).astype(out_ref.dtype)


def _pos_enc_cls_kernel(x_ref, bias_ref, out_ref, carry_ref):
    """cls-token path.  Output row r of the (B, N+1, E) result:
         r == 0 : bias[0]                 (cls token (+ its encoding row))
         r >= 1 : x[:, r-1, :] + bias[r]

    The +1 row shift is realized in-register: the tile is rotated by one sublane
    (XLU) and row 0 is replaced by the carry row (VPU select), then written with
    ONE aligned, lane-dense full-tile store.

    NOTE: the carry relies on (a) the row-tile axis being the innermost grid axis,
    executed in order per batch tile ("arbitrary"), and (b) scratch being per-core
    under megacore sharding of the (parallel) batch axis.  Both hold in current
    Pallas; do not reorder the grid without revisiting this.
    """
    j = pl.program_id(1)
    tn = x_ref.shape[1]

    @pl.when(j == 0)
    def _():
        # Row 0 of the whole output gets no x contribution (bias[0] already holds cls).
        carry_ref[...] = jnp.zeros_like(carry_ref)

    rolled = pltpu.roll(x_ref[...], shift=1, axis=1)              # XLU sublane rotate
    row = jax.lax.broadcasted_iota(jnp.int32, (1, tn, 1), 1)
    shifted = jnp.where(row == 0, carry_ref[...], rolled)          # VPU select

    out_ref[...] = (shifted + _bias_block(bias_ref, j, tn)).astype(out_ref.dtype)

    # Last x row of this tile feeds row 0 of the next row-tile of the same batch tile.
    carry_ref[...] = x_ref[:, tn - 1: tn, :]


# ---------------------------------------------------------------------------
# Tiling / config helpers
# ---------------------------------------------------------------------------
def _round_up(n, m):
    return ((n + m - 1) // m) * m


def _choose_tiles(batch, rows, emb, x_itemsize, out_itemsize, *, row_tile=None,
                  batch_tile=None, target_bytes=4 << 20, max_batch_tile=None):
    """Pick (batch_tile, row_tile).

    Row tile is a multiple of the sublane packing (8 rows f32, 16 rows bf16), sized
    so one block is ~target_bytes, then balanced so the last row tile is not nearly
    empty.  Batch is folded into the block from the remaining budget.  max_batch_tile
    lets the cls path guarantee >= 2 batch tiles for v7x megacore.
    """
    min_item = max(1, min(int(x_itemsize), int(out_itemsize)))
    max_item = max(int(x_itemsize), int(out_itemsize))
    sublane = 8 * max(1, 4 // min_item)
    row_bytes = emb * max_item
    rows_pad = _round_up(rows, sublane)

    if row_tile is not None:
        tn = min(_round_up(int(row_tile), sublane), rows_pad)
    else:
        tn_budget = max(sublane, (target_bytes // max(1, row_bytes)) // sublane * sublane)
        tn_max = min(rows_pad, tn_budget)
        nr = pl.cdiv(rows, tn_max)
        # Balanced row tiles: same number of tiles, minimal waste in the last one.
        tn = _round_up(pl.cdiv(rows, nr), sublane)

    if batch_tile is not None:
        bt = max(1, min(batch, int(batch_tile)))
    else:
        bt = max(1, min(batch, target_bytes // max(1, tn * row_bytes)))
    if max_batch_tile is not None:
        bt = min(bt, max(1, int(max_batch_tile)))
    return int(bt), int(tn)


def _vmem_limit(bt, tn, emb, x_itemsize, out_itemsize, bias_rows, bias_itemsize):
    """Accurate scoped-VMEM budget: double-buffered x/out blocks + bias + carry + slack."""
    x_blk = bt * tn * emb * x_itemsize
    out_blk = bt * tn * emb * out_itemsize
    bias_bytes = 2 * bias_rows * emb * bias_itemsize    # conservative (double-buffered)
    carry = bt * emb * x_itemsize
    need = 2 * (x_blk + out_blk) + bias_bytes + carry
    slack = out_blk + (2 << 20)                          # compiler temporaries + headroom
    return int(min(need + slack, 100 << 20))


def _canon_cls(cls_token, emb):
    cls = jnp.asarray(cls_token)
    cls = cls.reshape(-1, cls.shape[-1])
    assert cls.shape == (1, emb), f"cls_token must reshape to (1, {emb}), got {cls.shape}"
    return cls


def _make_bias(encoding, cls_token, encode_cls_token, n, emb, out_dtype):
    """(N+1, E) per-row bias: row 0 is what lands in the cls slot, rows 1..N are what is
    added to the corresponding input row.  Tiny; callers doing repeated inference can
    precompute this outside jit and reuse it."""
    enc = jnp.asarray(encoding)
    enc = enc.reshape(enc.shape[-2], enc.shape[-1]).astype(out_dtype)
    cls = _canon_cls(cls_token, emb).astype(out_dtype)
    if encode_cls_token:
        assert enc.shape == (n + 1, emb), f"encoding must be ({n + 1}, {emb}), got {enc.shape}"
        return jnp.concatenate([cls + enc[0:1], enc[1:]], axis=0)
    assert enc.shape == (n, emb), f"encoding must be ({n}, {emb}), got {enc.shape}"
    return jnp.concatenate([cls, enc], axis=0)


def _prepare_bias(bias, tn, nr, resident_bias_bytes):
    """Decide between a fully VMEM-resident bias (constant index map -> one HBM fetch)
    and a per-row-tile bias DMA (only for very large tables)."""
    rows, emb = bias.shape
    padded_rows = nr * tn
    resident = padded_rows * emb * bias.dtype.itemsize <= int(resident_bias_bytes)
    if resident:
        if padded_rows > rows:
            bias = jnp.pad(bias, ((0, padded_rows - rows), (0, 0)))
        spec = pl.BlockSpec((padded_rows, emb), lambda bi, j: (0, 0))
        return bias, spec, padded_rows
    spec = pl.BlockSpec((tn, emb), lambda bi, j: (j, 0))
    return bias, spec, tn


# ---------------------------------------------------------------------------
# pallas_call dispatchers
# ---------------------------------------------------------------------------
def _pos_enc_with_cls(x, bias, *, bt, tn, out_dtype, resident_bias_bytes):
    B, N, E = x.shape
    S = N + 1
    nb, nr = pl.cdiv(B, bt), pl.cdiv(S, tn)
    # Last x row-block that still overlaps x (the final output tile may only need the carry).
    max_xj = max(pl.cdiv(N, tn) - 1, 0)

    bias, bias_spec, bias_rows = _prepare_bias(bias, tn, nr, resident_bias_bytes)

    return pl.pallas_call(
        _pos_enc_cls_kernel,
        out_shape=jax.ShapeDtypeStruct((B, S, E), out_dtype),
        grid=(nb, nr),
        in_specs=[
            pl.BlockSpec((bt, tn, E), lambda bi, j: (bi, jnp.minimum(j, max_xj), 0)),
            bias_spec,
        ],
        out_specs=pl.BlockSpec((bt, tn, E), lambda bi, j: (bi, j, 0)),
        scratch_shapes=[pltpu.VMEM((bt, 1, E), x.dtype)],
        compiler_params=pltpu.CompilerParams(
            # Batch tiles are independent (megacore on v7x); row tiles carry state and
            # must run in order (innermost axis, "arbitrary").
            dimension_semantics=("parallel", "arbitrary"),
            vmem_limit_bytes=_vmem_limit(bt, tn, E, x.dtype.itemsize,
                                         jnp.dtype(out_dtype).itemsize,
                                         bias_rows, bias.dtype.itemsize),
        ),
    )(x, bias)


def _pos_enc_no_cls(x, bias, *, bt, tn, out_dtype, resident_bias_bytes):
    # NOTE: XLA's fused broadcast-add is already near roofline for this path; the Pallas
    # kernel is kept for a uniform API and guaranteed single-pass, lane-dense stores.
    B, N, E = x.shape
    nb, nr = pl.cdiv(B, bt), pl.cdiv(N, tn)
    bias, bias_spec, bias_rows = _prepare_bias(bias, tn, nr, resident_bias_bytes)

    return pl.pallas_call(
        _pos_enc_add_kernel,
        out_shape=jax.ShapeDtypeStruct((B, N, E), out_dtype),
        grid=(nb, nr),
        in_specs=[
            pl.BlockSpec((bt, tn, E), lambda bi, j: (bi, j, 0)),
            bias_spec,
        ],
        out_specs=pl.BlockSpec((bt, tn, E), lambda bi, j: (bi, j, 0)),
        compiler_params=pltpu.CompilerParams(
            dimension_semantics=("parallel", "parallel"),
            vmem_limit_bytes=_vmem_limit(bt, tn, E, x.dtype.itemsize,
                                         jnp.dtype(out_dtype).itemsize,
                                         bias_rows, bias.dtype.itemsize),
        ),
    )(x, bias)


# ---------------------------------------------------------------------------
# Public wrapper
# ---------------------------------------------------------------------------
@functools.partial(jax.jit, static_argnames=("encode_cls_token", "row_tile", "batch_tile",
                                              "out_dtype", "target_bytes",
                                              "resident_bias_bytes"))
def position_encoding_forward(x, cls_token, encoding, *, encode_cls_token=True,
                              row_tile=None, batch_tile=None, out_dtype=None,
                              target_bytes=4 << 20, resident_bias_bytes=8 << 20):
    """Pallas implementation of PositionEncoding.forward.

    x        : (B, N, E) float.  For best store bandwidth E should be a multiple of 128.
    cls_token: (1, E) / (1, 1, E) / (E,) float, or None
    encoding : (N+1, E) if (cls_token is not None and encode_cls_token) else (N, E)
    out_dtype: optional override (e.g. jnp.bfloat16) to avoid f32 promotion of the output.
    """
    B, N, E = x.shape

    # Match PyTorch type promotion unless the caller overrides it.
    dtypes = [x.dtype, jnp.asarray(encoding).dtype]
    if cls_token is not None:
        dtypes.append(jnp.asarray(cls_token).dtype)
    if out_dtype is None:
        out_dtype = jnp.result_type(*dtypes)
    out_dtype = jnp.dtype(out_dtype)
    out_itemsize = out_dtype.itemsize

    if cls_token is None:
        enc = jnp.asarray(encoding)
        bias = enc.reshape(enc.shape[-2], enc.shape[-1]).astype(out_dtype)
        assert bias.shape == (N, E), f"encoding must be ({N}, {E}) when cls_token is None"
        bt, tn = _choose_tiles(B, N, E, x.dtype.itemsize, out_itemsize,
                               row_tile=row_tile, batch_tile=batch_tile,
                               target_bytes=target_bytes)
        return _pos_enc_no_cls(x, bias, bt=bt, tn=tn, out_dtype=out_dtype,
                               resident_bias_bytes=resident_bias_bytes)

    bias = _make_bias(encoding, cls_token, encode_cls_token, N, E, out_dtype)  # (N+1, E)
    # The row axis is sequential (carry), so v7x megacore can only split on batch tiles:
    # unless the caller pinned batch_tile, guarantee >= 2 batch tiles whenever B >= 2.
    max_bt = None if batch_tile is not None else -(-B // 2)
    bt, tn = _choose_tiles(B, N + 1, E, x.dtype.itemsize, out_itemsize,
                           row_tile=row_tile, batch_tile=batch_tile,
                           target_bytes=target_bytes, max_batch_tile=max_bt)
    return _pos_enc_with_cls(x, bias, bt=bt, tn=tn, out_dtype=out_dtype,
                             resident_bias_bytes=resident_bias_bytes)


# ---------------------------------------------------------------------------
# Pure-JAX reference (mirrors the PyTorch forward exactly)
# ---------------------------------------------------------------------------
def _reference_forward(x, cls_token, encoding, encode_cls_token):
    enc = jnp.asarray(encoding)
    enc = enc.reshape(enc.shape[-2], enc.shape[-1])

    def cat_cls(proj, tok):
        if tok is None:
            return proj
        tok = jnp.asarray(tok)
        tok = tok.reshape(1, tok.shape[-1])
        b = proj.shape[0]
        tok = jnp.broadcast_to(tok[None], (b,) + tok.shape)
        return jnp.concatenate([tok, proj], axis=1)

    if encode_cls_token:
        return cat_cls(x, cls_token) + enc
    return cat_cls(x + enc, cls_token)


# ---------------------------------------------------------------------------
if __name__ == "__main__":
    key = jax.random.PRNGKey(0)
    ks = jax.random.split(key, 8)

    # --- Case 1: encode_cls_token=True, lane-dense E=128 ---------------------
    B, N, E = 2, 63, 128
    x = jax.random.normal(ks[0], (B, N, E), jnp.float32)
    cls_tok = jax.random.normal(ks[1], (1, E), jnp.float32)
    enc = 0.02 * jax.random.normal(ks[2], (N + 1, E), jnp.float32)
    out = position_encoding_forward(x, cls_tok, enc, encode_cls_token=True)
    jax.block_until_ready(out)
    ref = _reference_forward(x, cls_tok, enc, True)
    assert out.shape == (B, N + 1, E)
    assert jnp.allclose(out, ref, atol=1e-6)

    # --- Case 2: encode_cls_token=False --------------------------------------
    B, N, E = 3, 24, 256
    x = jax.random.normal(ks[3], (B, N, E), jnp.float32)
    cls_tok = jax.random.normal(ks[4], (1, E), jnp.float32)
    enc = 0.02 * jax.random.normal(ks[5], (N, E), jnp.float32)
    out = position_encoding_forward(x, cls_tok, enc, encode_cls_token=False)
    jax.block_until_ready(out)
    ref = _reference_forward(x, cls_tok, enc, False)
    assert out.shape == (B, N + 1, E)
    assert jnp.allclose(out, ref, atol=1e-6)

    # --- Case 3: cls_token=None ----------------------------------------------
    B, N, E = 2, 40, 128
    x = jax.random.normal(ks[6], (B, N, E), jnp.float32)
    enc = 0.02 * jax.random.normal(ks[7], (N, E), jnp.float32)
    out = position_encoding_forward(x, None, enc, encode_cls_token=False)
    jax.block_until_ready(out)
    ref = _reference_forward(x, None, enc, False)
    assert out.shape == (B, N, E)
    assert jnp.allclose(out, ref, atol=1e-6)

    # --- Case 4: forced multi row-tile incl. S = k*tn + 1 trailing tile ------
    B, N, E = 2, 32, 128
    x = jax.random.normal(ks[0], (B, N, E), jnp.float32)
    cls_tok = jax.random.normal(ks[1], (1, 1, E), jnp.float32)   # torch-style (1,1,E)
    enc = 0.02 * jax.random.normal(ks[2], (N + 1, E), jnp.float32)
    out = position_encoding_forward(x, cls_tok, enc, encode_cls_token=True,
                                    row_tile=8, batch_tile=1)
    jax.block_until_ready(out)
    ref = _reference_forward(x, cls_tok, enc, True)
    assert out.shape == (B, N + 1, E)
    assert jnp.allclose(out, ref, atol=1e-6)

    # --- Case 5: mixed precision (bf16 activations + f32 params -> f32 output)
    B, N, E = 2, 15, 128
    x = jax.random.normal(ks[3], (B, N, E), jnp.float32).astype(jnp.bfloat16)
    cls_tok = jax.random.normal(ks[4], (1, E), jnp.float32)
    enc = 0.02 * jax.random.normal(ks[5], (N + 1, E), jnp.float32)
    out = position_encoding_forward(x, cls_tok, enc, encode_cls_token=True)
    jax.block_until_ready(out)
    ref = _reference_forward(x.astype(jnp.float32), cls_tok, enc, True)
    assert out.dtype == jnp.float32
    assert jnp.allclose(out, ref, atol=1e-5)

    # --- Case 6: force the non-resident (tiled) bias fallback path -----------
    B, N, E = 2, 17, 128
    x = jax.random.normal(ks[6], (B, N, E), jnp.float32)
    cls_tok = jax.random.normal(ks[7], (1, E), jnp.float32)
    enc = 0.02 * jax.random.normal(ks[0], (N + 1, E), jnp.float32)
    out = position_encoding_forward(x, cls_tok, enc, encode_cls_token=True,
                                    row_tile=8, resident_bias_bytes=0)
    jax.block_until_ready(out)
    ref = _reference_forward(x, cls_tok, enc, True)
    assert out.shape == (B, N + 1, E)
    assert jnp.allclose(out, ref, atol=1e-6)

    # --- Case 7: out_dtype override (bf16 output, halves HBM write bytes) ----
    B, N, E = 2, 16, 128
    x = jax.random.normal(ks[1], (B, N, E), jnp.float32)
    cls_tok = jax.random.normal(ks[2], (1, E), jnp.float32)
    enc = 0.02 * jax.random.normal(ks[3], (N + 1, E), jnp.float32)
    out = position_encoding_forward(x, cls_tok, enc, encode_cls_token=True,
                                    out_dtype=jnp.bfloat16)
    jax.block_until_ready(out)
    ref = _reference_forward(x, cls_tok, enc, True)
    assert out.dtype == jnp.bfloat16
    assert jnp.allclose(out.astype(jnp.float32), ref, atol=5e-2)

    print("KERNEL_OK")
</pallas_src>

<mosaic_0001>
module attributes {stable_mosaic.version = 11 : i64} {
  func.func @_pos_enc_cls_kernel(%arg0: i32, %arg1: i32, %arg2: memref<1x64x128xf32, #tpu.memory_space<vmem>>, %arg3: memref<64x128xf32, #tpu.memory_space<vmem>>, %arg4: memref<1x64x128xf32, #tpu.memory_space<vmem>>, %arg5: memref<1x1x128xf32, #tpu.memory_space<vmem>>) attributes {dimension_semantics = [#tpu.dimension_semantics<parallel>, #tpu.dimension_semantics<arbitrary>], iteration_bounds = array<i64: 2, 1>, scalar_prefetch = 0 : i64, scratch_operands = 1 : i64, tpu.core_type = #tpu.core_type<tc>, window_params = [{transform_indices = @transform_0, window_bounds = array<i64: 1, 64, 128>}, {pipeline_mode = #tpu.pipeline_mode<synchronous>, transform_indices = @transform_1, window_bounds = array<i64: 64, 128>}, {transform_indices = @transform_2, window_bounds = array<i64: 1, 64, 128>}]} {
    %c0_i32 = arith.constant 0 : i32
    %0 = arith.cmpi eq, %arg1, %c0_i32 : i32
    %1 = arith.extui %0 : i1 to i32
    %c0_i32_0 = arith.constant 0 : i32
    %2 = arith.cmpi ne, %1, %c0_i32_0 : i32
    scf.if %2 {
      %cst = arith.constant 0.000000e+00 : f32
      %20 = vector.broadcast %cst : f32 to vector<1x1x128xf32>
      %c0_17 = arith.constant 0 : index
      %c0_18 = arith.constant 0 : index
      %c0_19 = arith.constant 0 : index
      %21 = vector.load %arg5[%c0_17, %c0_18, %c0_19] : memref<1x1x128xf32, #tpu.memory_space<vmem>>, vector<1x1x128xf32>
      tpu.vector_store %arg5[%c0_17, %c0_18, %c0_19], %20 {strides = array<i32>} : memref<1x1x128xf32, #tpu.memory_space<vmem>>, vector<1x1x128xf32>,
    } else {
    }
    %c0 = arith.constant 0 : index
    %c0_1 = arith.constant 0 : index
    %c0_2 = arith.constant 0 : index
    %3 = vector.load %arg2[%c0, %c0_1, %c0_2] : memref<1x64x128xf32, #tpu.memory_space<vmem>>, vector<1x64x128xf32>
    %c1_i32 = arith.constant 1 : i32
    %4 = tpu.dynamic_rotate %3 by %c1_i32 dim 1 : vector<1x64x128xf32>, i32 -> vector<1x64x128xf32>
    %5 = tpu.iota {dimensions = array<i32: 1>} : vector<1x64x1xi32>
    %c0_i32_3 = arith.constant 0 : i32
    %6 = vector.broadcast %c0_i32_3 : i32 to vector<1x64x1xi32>
    %7 = arith.cmpi eq, %5, %6 : vector<1x64x1xi32>
    %c0_4 = arith.constant 0 : index
    %c0_5 = arith.constant 0 : index
    %c0_6 = arith.constant 0 : index
    %8 = vector.load %arg5[%c0_4, %c0_5, %c0_6] : memref<1x1x128xf32, #tpu.memory_space<vmem>>, vector<1x1x128xf32>
    %9 = vector.shape_cast %7 : vector<1x64x1xi1> to vector<1x64x1xi1>
    %10 = vector.broadcast %9 : vector<1x64x1xi1> to vector<1x64x128xi1>
    %11 = vector.shape_cast %8 : vector<1x1x128xf32> to vector<1x1x128xf32>
    %12 = vector.broadcast %11 : vector<1x1x128xf32> to vector<1x64x128xf32>
    %13 = arith.select %10, %12, %4 : vector<1x64x128xi1>, vector<1x64x128xf32>
    %c0_7 = arith.constant 0 : index
    %c0_8 = arith.constant 0 : index
    %14 = vector.load %arg3[%c0_7, %c0_8] : memref<64x128xf32, #tpu.memory_space<vmem>>, vector<64x128xf32>
    %15 = vector.shape_cast %14 : vector<64x128xf32> to vector<1x64x128xf32>
    %16 = arith.addf %13, %15 : vector<1x64x128xf32>
    %c0_9 = arith.constant 0 : index
    %c0_10 = arith.constant 0 : index
    %c0_11 = arith.constant 0 : index
    %17 = vector.load %arg4[%c0_9, %c0_10, %c0_11] : memref<1x64x128xf32, #tpu.memory_space<vmem>>, vector<1x64x128xf32>
    tpu.vector_store %arg4[%c0_9, %c0_10, %c0_11], %16 {strides = array<i32>} : memref<1x64x128xf32, #tpu.memory_space<vmem>>, vector<1x64x128xf32>,
    %c0_12 = arith.constant 0 : index
    %c63 = arith.constant 63 : index
    %c0_13 = arith.constant 0 : index
    %18 = vector.load %arg2[%c0_12, %c63, %c0_13] : memref<1x64x128xf32, #tpu.memory_space<vmem>>, vector<1x1x128xf32>
    %c0_14 = arith.constant 0 : index
    %c0_15 = arith.constant 0 : index
    %c0_16 = arith.constant 0 : index
    %19 = vector.load %arg5[%c0_14, %c0_15, %c0_16] : memref<1x1x128xf32, #tpu.memory_space<vmem>>, vector<1x1x128xf32>
    tpu.vector_store %arg5[%c0_14, %c0_15, %c0_16], %18 {strides = array<i32>} : memref<1x1x128xf32, #tpu.memory_space<vmem>>, vector<1x1x128xf32>,
    return
  }
  func.func @transform_0(%arg0: i32, %arg1: i32) -> (i32, i32, i32) {
    %c0_i32 = arith.constant 0 : i32
    %0 = arith.minsi %arg1, %c0_i32 : i32
    %c0_i32_0 = arith.constant 0 : i32
    %c0_i32_1 = arith.constant 0 : i32
    return %arg0, %0, %c0_i32_0 : i32, i32, i32
  }
  func.func @transform_1(%arg0: i32, %arg1: i32) -> (i32, i32) {
    %c0_i32 = arith.constant 0 : i32
    %c0_i32_0 = arith.constant 0 : i32
    %c0_i32_1 = arith.constant 0 : i32
    return %c0_i32, %c0_i32_0 : i32, i32
  }
  func.func @transform_2(%arg0: i32, %arg1: i32) -> (i32, i32, i32) {
    %c0_i32 = arith.constant 0 : i32
    %c0_i32_0 = arith.constant 0 : i32
    return %arg0, %arg1, %c0_i32 : i32, i32, i32
  }
}

</mosaic_0001>

<bundles_post_ra>
// kernel: position_encoding_forward.1
= control target key start
LH: loop header
LB: loop body
LE: loop exit
PB: predicated region body
PF: predicated region fallthrough
CT: control target
= control target key end

     0   :  { %7 = vsyncpa [#allocation4], 0  ;;  %s694_s0 = inlined_call_operand.vmem [shape: f32[2,63,128], index: 0, kind: input, shape index: {}]   ;;  %s695_s1 = inlined_call_operand.vmem [shape: f32[64,128], index: 1, kind: input, shape index: {}]   ;;  %s696_s2 = inlined_call_operand.hbm [shape: f32[2,64,128], index: 2, kind: output, shape index: {}]  }
   0x1   :  { %9 = vsyncpa [#allocation4 + $0x1], 0  ;;  %s557_s9 = smov 0   ;;  %s559_s10 = smov 0  }
   0x2   :  { %s561_s11 = smov 0   ;;  %s563_s12 = smov 0  }
   0x3   :  { %s565_s13 = smov 0   ;;  %s567_s14 = smov 0  }
   0x4 LB: > { %s385_s15 = sadd.s32 4294967295, %s537_s14   ;;  %s386_s16 = sadd.s32 4294967294, %s537_s14   ;;  %s537_s14 = sphi %s567_s14, %s15_s14   ;;  %s533_s13 = sphi %s565_s13, %s703_s13   ;;  %s529_s12 = sphi %s563_s12, %s702_s12   ;;  %s525_s11 = sphi %s561_s11, %s701_s11   ;;  %s521_s10 = sphi %s559_s10, %s700_s10   ;;  %s517_s9 = sphi %s557_s9, %s699_s9  }
   0x5   : > { %s27_s17 = sadd.s32 1, %s533_s13  ;;  %s89_s18 = sadd.s32 1, %s525_s11 }
   0x6   : > { %p29_p0 = scmp.ge.s32.totalorder %s27_s17, 2  ;;  %p99_p1 = scmp.ne.s32.totalorder %s525_s11, %s521_s10 }
   0x7   : > { %p100_p2 = scmp.eq.s32.totalorder %s385_s15, 1  ;;  %p105_p3 = scmp.ne.s32.totalorder %s521_s10, %s517_s9 }
   0x8   : > { %s705_s17 = smov (%p29_p0, %s27_s17), 0  ;;  %p106_p5 = scmp.eq.s32.totalorder %s386_s16, 1 }
   0x9   : > { %p597_p4 = por %p100_p2, %p99_p1  ;;  %s84_s20 = ssub.s32 %s533_s13, %s705_s17 }
   0xa   : > { %p389_p6 = scmp.ge.s32.totalorder %s537_s14, 1  ;;  %p87_p7 = scmp.eq.s32.totalorder %s84_s20, 0 }
   0xb   : > { %p604_p8 = por %p106_p5, %p105_p3  ;;  %p144_p9 = scmp.lt.s32.totalorder %s537_s14, 3 }
   0xc   : > { %s610_s22 = scalar_select %p87_p7, %s525_s11, %s89_s18  }
   0xd   : > { %p145_p10 = pnand %p389_p6, %p144_p9 }
   0xe   : > { %p175_p11 = scmp.lt.s32.totalorder (!%p145_p10), %s529_s12, 1  ;;  %s169_s24 = sand.u32 (!%p145_p10), 1, %s521_s10  }
   0xf   : > { %148 = sbr.rel (%p145_p10) target bundleno = 41 (0x29), region = 28  ;;  %s620_s29 = sshll.u32 (!%p145_p10), %s169_s24, 6 }
  0x10   : > { %s399_s8 = sshll.u32 (!%p145_p10), %s529_s12, 6  ;;  %s171_s3 = scalar_lea.vmem (!%p145_p10), [#allocation3], %s620_s29 }
  0x11   : > { %s302_s27 = scalar_lea.hbm (!%p145_p10), %s696_s2, %s399_s8  ;;  %s303_s6 = sshll.u32 (!%p145_p10), %s171_s3, 4  ;;  %s304_s6 = int_to_ptr.vmem [resolvable:$true] %s303_s6 }
  0x12   : > { %s305_s7 = sshll.u32 (!%p145_p10), %s302_s27, 4  ;;  %s289_s29 = scalar_lea.sflag (!%p145_p10), [#allocation4], %s169_s24  ;;  %s306_s7 = int_to_ptr.hbm [resolvable:$true] %s305_s7 }
  0x13   : > { %s473_s8 = sshra.s32 (!%p145_p10), %s306_s7, 4  ;;  %s479_s20 = scalar_lea.hbm (!%p145_p10), %s696_s2, 128  ;;  %s474_s8 = int_to_ptr.hbm [resolvable:$true] %s473_s8 }
  0x14   : > { %v208_v0 = vlaneseq  ;;  %v539_v1 = vmov 0.0   ;;  %s176_s23 = scalar_select %p175_p11, %s529_s12, 1  ;;  %v262_v5 = vld [vmem:[%s695_s1] sm:$0xff]  ;;  %v263_v7 = vld [vmem:[%s695_s1 + $0x8] sm:$0xff]  ;;  %v264_v11 = vld [vmem:[%s695_s1 + $0x10] sm:$0xff] }
  0x15   : > { %191 = vst [vmem:[#allocation2] sm:$0x1] %v539_v1  ;;  %v265_v19 = vld [vmem:[%s695_s1 + $0x18] sm:$0xff]  ;;  %v266_v25 = vld [vmem:[%s695_s1 + $0x20] sm:$0xff]  ;;  %v267_v33 = vld [vmem:[%s695_s1 + $0x28] sm:$0xff]  ;;  %s475_s15 = scalar_lea.hbm %s474_s8, 64  ;;  %p480_p1 = scmp.lt.s32.totalorder %s474_s8, %s696_s2 }
  0x16   : > { %v209_v2 = vshrl.u32 %v208_v0, 7  ;;  %s398_s25 = sshll.u32 %s176_s23, 6  ;;  %v268_v38 = vld [vmem:[%s695_s1 + $0x30] sm:$0xff]  ;;  %v269_v42 = vld [vmem:[%s695_s1 + $0x38] sm:$0xff]  ;;  %p476_p12 = scmp.ne.s32.totalorder %s474_s8, %s475_s15 }
  0x17   : > { %s182_s28 = scalar_lea.vmem %s694_s0, %s398_s25  ;;  %p481_p2 = scmp.lt.s32.totalorder %s479_s20, %s475_s15 }
  0x18   : > { %v192_v3 = vld [vmem:[%s182_s28] sm:$0xff]  ;;  %v199_v4 = vld [vmem:[%s182_s28 + $0x38] sm:$0xff]  ;;  %vm210_vm0 = vcmp.lt.s32.totalorder %v209_v2, 1  ;;  %vm226_vm1 = vcmp.eq.s32.totalorder %v209_v2, 0  ;;  %v193_v6 = vld [vmem:[%s182_s28 + $0x8] sm:$0xff]  ;;  %p477_p13 = pnand %p476_p12, %p597_p4 }
  0x19   : > { %v200_v8 = vrot.slane %v192_v3, 7  ;;  %v207_v9 = vrot.slane %v199_v4, 7  ;;  %v201_v12 = vrot.slane %v193_v6, 7  ;;  %v194_v13 = vld [vmem:[%s182_s28 + $0x10] sm:$0xff]  ;;  %v195_v14 = vld [vmem:[%s182_s28 + $0x18] sm:$0xff]  ;;  %v196_v15 = vld [vmem:[%s182_s28 + $0x20] sm:$0xff]  ;;  %p482_p3 = por %p481_p2, %p480_p1 }
  0x1a   : > { %v202_v17 = vrot.slane %v194_v13, 7  ;;  %v203_v18 = vrot.slane %v195_v14, 7  ;;  %v204_v20 = vrot.slane %v196_v15, 7  ;;  %v197_v21 = vld [vmem:[%s182_s28 + $0x28] sm:$0xff]  ;;  %v198_v22 = vld [vmem:[%s182_s28 + $0x30] sm:$0xff]  ;;  %p478_p0 = pneg %p477_p13 }
  0x1b   : > { %v218_v16 = vsel %vm210_vm0, %v207_v9, %v200_v8  ;;  %v217_v24 = vsel %vm210_vm0, %v200_v8, %v201_v12  ;;  %v205_v26 = vrot.slane %v197_v21, 7  ;;  %v206_v27 = vrot.slane %v198_v22, 7  ;;  %v286_v28 = vld [vmem:[%s182_s28 + $0x3f] sm:$0x1] }
  0x1c   : > { %v458_v10 = vld [vmem:[#allocation2] ss:$0 sm:$0xff]  ;;  %v271_v30 = vadd.f32 %v263_v7, %v217_v24  ;;  %v216_v31 = vsel %vm210_vm0, %v201_v12, %v202_v17  ;;  %v215_v32 = vsel %vm210_vm0, %v202_v17, %v203_v18  ;;  %v214_v36 = vsel %vm210_vm0, %v203_v18, %v204_v20  ;;  %p483_p5 = pnand %p482_p3, %p478_p0 }
  0x1d   : > { %v254_v23 = vsel %vm226_vm1, %v458_v10, %v218_v16  ;;  %287 = vst [vmem:[#allocation2] sm:$0x1] %v286_v28  ;;  %v272_v34 = vadd.f32 %v264_v11, %v216_v31  ;;  %v273_v35 = vadd.f32 %v265_v19, %v215_v32  ;;  %v213_v37 = vsel %vm210_vm0, %v204_v20, %v205_v26 }
  0x1e   : > { %v270_v29 = vadd.f32 %v262_v5, %v254_v23  ;;  %v274_v39 = vadd.f32 %v266_v25, %v214_v36  ;;  %v212_v40 = vsel %vm210_vm0, %v205_v26, %v206_v27  ;;  %v211_v41 = vsel %vm210_vm0, %v206_v27, %v207_v9  ;;  %279 = vst [vmem:[%s171_s3 + $0x8] sm:$0xff] %v271_v30 }
  0x1f   : > { %v275_v43 = vadd.f32 %v267_v33, %v213_v37  ;;  %280 = vst [vmem:[%s171_s3 + $0x10] sm:$0xff] %v272_v34  ;;  %v276_v44 = vadd.f32 %v268_v38, %v212_v40  ;;  %v277_v45 = vadd.f32 %v269_v42, %v211_v41 }
  0x20   : > { %278 = vst [vmem:[%s171_s3] sm:$0xff] %v270_v29 }
  0x21   : > { %281 = vst [vmem:[%s171_s3 + $0x18] sm:$0xff] %v273_v35 }
  0x22   : > { %282 = vst [vmem:[%s171_s3 + $0x20] sm:$0xff] %v274_v39 }
  0x23   : > { %283 = vst [vmem:[%s171_s3 + $0x28] sm:$0xff] %v275_v43 }
  0x24   : > { %284 = vst [vmem:[%s171_s3 + $0x30] sm:$0xff] %v276_v44 }
  0x25   : > { %285 = vst [vmem:[%s171_s3 + $0x38] sm:$0xff] %v277_v45 }
  0x26   : > { %486 = shalt.err (!%p483_p5)
}
  0x27   : > { %s540_s24 = smov 128   ;;  %s541_s25 = smov 8  }
  0x28   : > { %400 = dma.vmem_to_hbm [thread:$0]  (%p597_p4), %s304_s6, 1024, %s306_s7, %s289_s29, %s540_s24, %s540_s24, %s541_s25  }
  0x29 PF: > { %p406_p6 = scmp.ge.s32.totalorder %s537_s14, 2  ;;  %s320_s26 = sand.u32 1, %s517_s9  }
  0x2a   : > { %s321_s27 = scalar_lea.sflag [#allocation4], %s320_s26 }
  0x2b   : > { %p403_p7 = pnand %p406_p6, %p604_p8 }
  0x2d   : > { %p404_p9 = pneg %p403_p7 }
  0x2f   : > { %512 = dma.done.wait (%p404_p9), %s321_s27, 1024  }
  0x30   : > { %514 = vsyncadd (%p404_p9), %s321_s27, 4294966272  ;;  %s15_s14 = sadd.s32 1, %s537_s14   ;;  %s699_s9 = smov %s521_s10 }
  0x31   : > { %p12_p10 = scmp.ge.s32.totalorder %s15_s14, 4   ;;  %s700_s10 = smov %s525_s11 }
  0x32   : > { %s701_s11 = smov %s610_s22  ;;  %s702_s12 = smov %s533_s13 }
  0x33   : > { %s703_s13 = smov %s705_s17  ;;  %14 = sbr.rel (!%p12_p10) target bundleno = 4 (0x4), region = 67 }
  0x38   :  { %327 = vsyncpa [#allocation4], 1 }
  0x39   :  { %329 = vsyncpa [#allocation4 + $0x1], 1 }

</bundles_post_ra>
